<compile_context>
chip_gen: v7x
topology: tpu7x:2x2x1
jax: 0.10.0
libtpu: 0.0.40
codegen_flags: <defaults>
</compile_context>

<pallas_src>
import functools

import jax
import jax.numpy as jnp
from jax.experimental import pallas as pl
from jax.experimental.pallas import tpu as pltpu

_SUBLANE = 8                      # f32 sublane alignment
_MAX_TILE_M = 512                 # (feature, batch) rows per grid step
_DEFAULT_ONEHOT_MAX_ROWS = 2048   # one-hot path iff total padded rows <= this


def _round_up(x: int, m: int) -> int:
    return (x + m - 1) // m * m


# ---------------------------------------------------------------------------
# Path A: one-hot @ table on the MXU.  The whole concatenated table stays
# resident in VMEM (same block index every grid step); the flattened
# (feature, batch) axis is tiled by tile_m rows.
# ---------------------------------------------------------------------------
def _onehot_lookup_kernel(ids_ref, table_ref, out_ref):
    """ids_ref: (TM, 1) i32, table_ref: (R, D) f32 (resident), out_ref: (TM, D)."""
    tm = ids_ref.shape[0]
    r = table_ref.shape[0]
    iota = jax.lax.broadcasted_iota(jnp.int32, (tm, r), 1)
    onehot = (iota == ids_ref[...]).astype(table_ref.dtype)
    # one-hot @ table == table[ids]; exact (rows scaled by 1.0) on the MXU.
    out_ref[...] = jnp.dot(
        onehot, table_ref[...], preferred_element_type=jnp.float32
    ).astype(out_ref.dtype)


def _onehot_lookup(abs_ids, cat_table, tile_m):
    """abs_ids: (M_pad,) i32 absolute row ids; cat_table: (R, D) f32."""
    m_pad = abs_ids.shape[0]
    r, d = cat_table.shape
    return pl.pallas_call(
        _onehot_lookup_kernel,
        out_shape=jax.ShapeDtypeStruct((m_pad, d), jnp.float32),
        grid=(m_pad // tile_m,),
        in_specs=[
            pl.BlockSpec((tile_m, 1), lambda i: (i, 0)),
            # Constant block index -> table DMA'd once, stays resident.  Small
            # by construction (<= max_onehot_rows), so double-buffered copies
            # fit easily under the 32 MiB default scoped VMEM on v5e/v6e/v7x.
            pl.BlockSpec((r, d), lambda i: (0, 0)),
        ],
        # True-D output block: fewer HBM output bytes than 128-lane padding
        # (and no post-call strip-padding copy); masked stores are acceptable
        # for this mem-bound lookup.
        out_specs=pl.BlockSpec((tile_m, d), lambda i: (i, 0)),
        compiler_params=pltpu.CompilerParams(
            # Single output-disjoint axis; on v7x megacore both cores just
            # re-load the (small, resident) table once each.
            dimension_semantics=("parallel",),
        ),
    )(abs_ids.reshape(m_pad, 1), cat_table)


# ---------------------------------------------------------------------------
# Path B: DMA gather for large total cardinality.  Table stays in HBM; ids are
# scalar-prefetched into SMEM; one async row copy per output row, all issued
# then drained (maximally overlapped), writing straight into the output block.
# ---------------------------------------------------------------------------
def _gather_lookup_kernel(ids_smem, table_hbm, out_ref, sem):
    """ids_smem: (M_pad,) i32 SMEM; table_hbm: (R, D) HBM; out_ref: (TM, D)."""
    tm = out_ref.shape[0]
    base = pl.program_id(0) * tm

    def _issue(i, carry):
        row = ids_smem[base + i]
        pltpu.make_async_copy(
            table_hbm.at[pl.ds(row, 1)], out_ref.at[pl.ds(i, 1)], sem
        ).start()
        return carry

    jax.lax.fori_loop(0, tm, _issue, 0)

    def _drain(i, carry):
        # All copies are identical (1, D) rows; waiting tm times on the shared
        # semaphore drains exactly the bytes that were signalled.
        pltpu.make_async_copy(
            table_hbm.at[pl.ds(0, 1)], out_ref.at[pl.ds(0, 1)], sem
        ).wait()
        return carry

    jax.lax.fori_loop(0, tm, _drain, 0)


def _gather_lookup(abs_ids, cat_table, tile_m):
    m_pad = abs_ids.shape[0]
    r, d = cat_table.shape
    return pl.pallas_call(
        _gather_lookup_kernel,
        out_shape=jax.ShapeDtypeStruct((m_pad, d), jnp.float32),
        grid_spec=pltpu.PrefetchScalarGridSpec(
            num_scalar_prefetch=1,                      # abs_ids -> SMEM
            grid=(m_pad // tile_m,),
            in_specs=[pl.BlockSpec(memory_space=pl.ANY)],   # table stays in HBM
            out_specs=pl.BlockSpec((tile_m, d), lambda i, ids: (i, 0)),
            scratch_shapes=[pltpu.SemaphoreType.DMA(())],
        ),
        compiler_params=pltpu.CompilerParams(
            dimension_semantics=("arbitrary",),
        ),
    )(abs_ids, cat_table)


# ---------------------------------------------------------------------------
# Forward wrapper (one jit, one pallas_call per forward).
# ---------------------------------------------------------------------------
@functools.partial(
    jax.jit, static_argnames=("feature_names", "offsets", "use_onehot")
)
def _sparse_embedding_forward(cat_table, inputs, *, feature_names, offsets,
                              use_onehot):
    """inputs: (B, F) int ids in feature_names order; cat_table: (R, D) f32."""
    b = inputs.shape[0]
    f = len(feature_names)
    d = cat_table.shape[1]

    # Static per-requested-feature row offsets into the concatenated table.
    # This IS the feature permutation -- no table copy is ever made.
    off = jnp.asarray(offsets, dtype=jnp.int32)              # (F,)
    ids = jnp.transpose(inputs.astype(jnp.int32))            # (F, B)
    abs_ids = ids + off[:, None]                             # (F, B) absolute rows

    b_pad = _round_up(b, _SUBLANE)
    m = f * b_pad
    tile_m = min(_MAX_TILE_M, _round_up(m, _SUBLANE))
    m_pad = _round_up(m, tile_m)

    abs_flat = jnp.pad(abs_ids, ((0, 0), (0, b_pad - b))).reshape(m)
    abs_flat = jnp.pad(abs_flat, (0, m_pad - m))              # padding -> row 0

    if use_onehot:
        out = _onehot_lookup(abs_flat, cat_table, tile_m)     # (m_pad, D)
    else:
        out = _gather_lookup(abs_flat, cat_table, tile_m)     # (m_pad, D)

    out = out[:m].reshape(f, b_pad, d)[:, :b, :]              # (F, B, D)
    return {name: out[i] for i, name in enumerate(feature_names)}


class SparseEmbedding:
    """JAX/Pallas port of prm.model.SparseEmbedding (bag-size-1 'mean')."""

    def __init__(self, cardinalities: dict[str, int], embedding_dim: int, key,
                 max_onehot_rows: int = _DEFAULT_ONEHOT_MAX_ROWS):
        self.embedding_dim = embedding_dim
        self.cardinalities = dict(cardinalities)

        self.tables = {}
        self._row_offset = {}
        blocks = []
        offset = 0
        for i, (name, card) in enumerate(self.cardinalities.items()):
            # nn.EmbeddingBag default init is N(0, 1); deterministic per-feature key.
            subkey = jax.random.fold_in(key, i)
            t = jax.random.normal(subkey, (card, embedding_dim), dtype=jnp.float32)
            self.tables[name] = t
            self._row_offset[name] = offset
            rows = _round_up(card, _SUBLANE)       # per-feature padding only
            blocks.append(jnp.pad(t, ((0, rows - card), (0, 0))))
            offset += rows
        # (R_total, D) f32 -- concatenated once at init; no global-max padding,
        # no embedding-dim padding.
        self.cat_table = jnp.concatenate(blocks, axis=0)
        self.total_rows = offset
        # Path selection: VMEM-resident one-hot/MXU path for small total
        # cardinality, HBM-resident DMA gather otherwise (O(B*D) table reads).
        self._use_onehot = self.total_rows <= max_onehot_rows
        # TODO(synk): optionally store the table in bfloat16 (halves table HBM
        # traffic) when the model tolerates bf16 embedding values.

    def __call__(self, inputs: jax.Array,
                 feature_names: list[str]) -> dict[str, jax.Array]:
        names = tuple(feature_names)
        assert inputs.shape[1] == len(names)
        offsets = tuple(self._row_offset[n] for n in names)
        return _sparse_embedding_forward(
            self.cat_table, inputs,
            feature_names=names, offsets=offsets, use_onehot=self._use_onehot)


if __name__ == "__main__":
    key = jax.random.PRNGKey(0)

    cardinalities = {"user_id": 53, "item_id": 37, "category": 11}
    embedding_dim = 32
    batch = 8
    feature_names = list(cardinalities.keys())

    # deterministic example inputs: (batch, num_features) int32 category ids
    ikey = jax.random.fold_in(key, 1000)
    cols = []
    for i, name in enumerate(feature_names):
        cols.append(
            jax.random.randint(
                jax.random.fold_in(ikey, i), (batch,), 0,
                cardinalities[name], dtype=jnp.int32,
            )
        )
    inputs = jnp.stack(cols, axis=1)  # (batch, num_features)

    # Path A: one-hot / MXU path (small total cardinality).
    model = SparseEmbedding(cardinalities, embedding_dim, key)
    assert model._use_onehot
    outs = model(inputs, feature_names)
    outs = jax.tree_util.tree_map(jax.block_until_ready, outs)

    # Path B: DMA-gather path, forced (same key -> identical tables).
    model_g = SparseEmbedding(cardinalities, embedding_dim, key,
                              max_onehot_rows=0)
    assert not model_g._use_onehot
    outs_g = model_g(inputs, feature_names)
    outs_g = jax.tree_util.tree_map(jax.block_until_ready, outs_g)

    # Permuted / subset feature order exercises the offset-permutation path
    # (no table copy).
    perm_names = ["category", "user_id"]
    perm_inputs = jnp.stack([inputs[:, 2], inputs[:, 0]], axis=1)
    outs_p = model(perm_inputs, perm_names)
    outs_p = jax.tree_util.tree_map(jax.block_until_ready, outs_p)

    # sanity checks against pure-JAX reference (mean over size-1 bag == take)
    ok = True
    for idx, name in enumerate(feature_names):
        ref = jnp.take(model.tables[name], inputs[:, idx], axis=0)
        assert outs[name].shape == (batch, embedding_dim)
        assert outs_g[name].shape == (batch, embedding_dim)
        ok &= bool(jnp.allclose(outs[name], ref, atol=1e-5))
        ok &= bool(jnp.allclose(outs_g[name], ref, atol=1e-5))
    for idx, name in enumerate(perm_names):
        ref = jnp.take(model.tables[name], perm_inputs[:, idx], axis=0)
        ok &= bool(jnp.allclose(outs_p[name], ref, atol=1e-5))
    assert ok, "mismatch vs reference"

    print("KERNEL_OK")
</pallas_src>

<mosaic_0001>
module attributes {stable_mosaic.version = 11 : i64} {
  func.func @_onehot_lookup_kernel(%arg0: i32, %arg1: memref<24x1xi32, #tpu.memory_space<vmem>>, %arg2: memref<112x32xf32, #tpu.memory_space<vmem>>, %arg3: memref<24x32xf32, #tpu.memory_space<vmem>>) attributes {dimension_semantics = [#tpu.dimension_semantics<parallel>], iteration_bounds = array<i64: 1>, scalar_prefetch = 0 : i64, scratch_operands = 0 : i64, tpu.core_type = #tpu.core_type<tc>, window_params = [{transform_indices = @transform_0, window_bounds = array<i64: 24, 1>}, {pipeline_mode = #tpu.pipeline_mode<synchronous>, transform_indices = @transform_1, window_bounds = array<i64: 112, 32>}, {transform_indices = @transform_2, window_bounds = array<i64: 24, 32>}]} {
    %0 = tpu.iota {dimensions = array<i32: 1>} : vector<24x112xi32>
    %c0 = arith.constant 0 : index
    %c0_0 = arith.constant 0 : index
    %1 = vector.load %arg1[%c0, %c0_0] : memref<24x1xi32, #tpu.memory_space<vmem>>, vector<24x1xi32>
    %2 = vector.broadcast %1 : vector<24x1xi32> to vector<24x112xi32>
    %3 = arith.cmpi eq, %0, %2 : vector<24x112xi32>
    %4 = arith.extui %3 : vector<24x112xi1> to vector<24x112xi32>
    %5 = arith.sitofp %4 : vector<24x112xi32> to vector<24x112xf32>
    %c0_1 = arith.constant 0 : index
    %c0_2 = arith.constant 0 : index
    %6 = vector.load %arg2[%c0_1, %c0_2] : memref<112x32xf32, #tpu.memory_space<vmem>>, vector<112x32xf32>
    %cst = arith.constant dense<0.000000e+00> : vector<24x32xf32>
    %7 = tpu.matmul %5, %6, %cst {dimension_numbers = #tpu.dot_dimension_numbers<[1], [0], [0], [1], [0, 0, 1, 1], [], []>} : vector<24x112xf32>, vector<112x32xf32>, vector<24x32xf32> -> vector<24x32xf32>
    %c0_3 = arith.constant 0 : index
    %c0_4 = arith.constant 0 : index
    %8 = vector.load %arg3[%c0_3, %c0_4] : memref<24x32xf32, #tpu.memory_space<vmem>>, vector<24x32xf32>
    tpu.vector_store %arg3[%c0_3, %c0_4], %7 {strides = array<i32>} : memref<24x32xf32, #tpu.memory_space<vmem>>, vector<24x32xf32>,
    return
  }
  func.func @transform_0(%arg0: i32) -> (i32, i32) {
    %c0_i32 = arith.constant 0 : i32
    %c0_i32_0 = arith.constant 0 : i32
    return %arg0, %c0_i32 : i32, i32
  }
  func.func @transform_1(%arg0: i32) -> (i32, i32) {
    %c0_i32 = arith.constant 0 : i32
    %c0_i32_0 = arith.constant 0 : i32
    %c0_i32_1 = arith.constant 0 : i32
    return %c0_i32, %c0_i32_0 : i32, i32
  }
  func.func @transform_2(%arg0: i32) -> (i32, i32) {
    %c0_i32 = arith.constant 0 : i32
    %c0_i32_0 = arith.constant 0 : i32
    return %arg0, %c0_i32 : i32, i32
  }
}

</mosaic_0001>

<bundles_post_ra>
// kernel: _sparse_embedding_forward.1
= control target key start
LH: loop header
LB: loop body
LE: loop exit
PB: predicated region body
PF: predicated region fallthrough
CT: control target
= control target key end

     0   :  { %v247_v0 = vmov 0   ;;  %v248_v7 = vmov 0.0|0.0   ;;  %vm249_vm0 = vmmov 0   ;;  %v250_v10 = vmov 0.0   ;;  %s329_s0 = inlined_call_operand.vmem [shape: s32[24,1], index: 0, kind: input, shape index: {}]   ;;  %s330_s1 = inlined_call_operand.vmem [shape: f32[112,32], index: 1, kind: input, shape index: {}]   ;;  %s331_s2 = inlined_call_operand.vmem [shape: f32[24,32], index: 2, kind: output, shape index: {}]  }
   0x1   :  { %245 = vset.pattern.permute.xlu0 %v247_v0  ;;  %v14_v1 = vld [vmem:[%s329_s0 + $0x8] sm:$0xff]  ;;  %246 = vset.pattern.permute.xlu1 %v247_v0  ;;  %v15_v2 = vld [vmem:[%s329_s0 + $0x10] sm:$0xff]  ;;  %v34_v3 = vld [vmem:[%s330_s1] sm:$0xff]  ;;  %v11_v27 = vlaneseq  ;;  %vm48_vm1 = vcmask 916480   ;;  %vm138_vm5 = vcmask 261120  }
   0x2   :  { %20 = vperm.xlu0 %245, %v14_v1   ;;  %23 = vperm.xlu1 %246, %v15_v2   ;;  %v35_v4 = vld [vmem:[%s330_s1 + $0x8] sm:$0xff]  ;;  %v36_v5 = vld [vmem:[%s330_s1 + $0x10] sm:$0xff]  ;;  %v13_v6 = vld [vmem:[%s329_s0] sm:$0xff] }
   0x3   :  { %227 = vmatprep.subr.bf16.mxu1 %v248_v7  ;;  %v207_v8 = vpack.c.bf16 %v35_v4, %v34_v3  ;;  %206 = vmatprep.subr.bf16.mxu0 %v248_v7  ;;  %v37_v9 = vld [vmem:[%s330_s1 + $0x18] sm:$0xff]  ;;  %v38_v12 = vld [vmem:[%s330_s1 + $0x20] sm:$0xff]  ;;  %v39_v13 = vld [vmem:[%s330_s1 + $0x28] sm:$0xff]  ;;  %v12_v28 = vand.u32 127, %v11_v27 }
   0x4   :  { %200 = vmatprep.mubr.msk.f32.mxu1 %vm249_vm0, %v250_v10  ;;  %197 = vmatprep.mubr.msk.f32.mxu0 %vm249_vm0, %v250_v10  ;;  %v210_v11 = vpack.c.bf16 %v37_v9, %v36_v5  ;;  %v213_v14 = vpack.c.bf16 %v39_v13, %v38_v12  ;;  %v40_v15 = vld [vmem:[%s330_s1 + $0x30] sm:$0xff]  ;;  %v41_v16 = vld [vmem:[%s330_s1 + $0x38] sm:$0xff]  ;;  %v42_v18 = vld [vmem:[%s330_s1 + $0x40] sm:$0xff] }
   0x5   :  { %234 = vmatpush3.bf16.msra.mxu1 %v207_v8  ;;  %208 = vmatpush3.bf16.msra.mxu0 %v207_v8  ;;  %v216_v17 = vpack.c.bf16 %v41_v16, %v40_v15  ;;  %v43_v19 = vld [vmem:[%s330_s1 + $0x48] sm:$0xff]  ;;  %v44_v21 = vld [vmem:[%s330_s1 + $0x50] sm:$0xff]  ;;  %v45_v22 = vld [vmem:[%s330_s1 + $0x58] sm:$0xff] }
   0x6   :  { %17 = vperm.xlu0 %245, %v13_v6   ;;  %228 = vmatprep.subr.bf16.mxu1 %v248_v7  ;;  %v219_v20 = vpack.c.bf16 %v43_v19, %v42_v18  ;;  %v222_v23 = vpack.c.bf16 %v45_v22, %v44_v21  ;;  %v46_v24 = vld [vmem:[%s330_s1 + $0x60] sm:$0xff]  ;;  %v47_v25 = vld [vmem:[%s330_s1 + $0x68] sm:$0xff] }
   0x7   :  { %209 = vmatprep.subr.bf16.mxu0 %v248_v7  ;;  %v225_v26 = vpack.c.bf16 %v47_v25, %v46_v24 }
   0x9   :  { %235 = vmatpush3.bf16.msra.mxu1 %v210_v11  ;;  %211 = vmatpush3.bf16.msra.mxu0 %v210_v11 }
   0xa   :  { %229 = vmatprep.subr.bf16.mxu1 %v248_v7  ;;  %212 = vmatprep.subr.bf16.mxu0 %v248_v7 }
   0xd   :  { %236 = vmatpush3.bf16.msra.mxu1 %v213_v14  ;;  %214 = vmatpush3.bf16.msra.mxu0 %v213_v14 }
   0xe   :  { %230 = vmatprep.subr.bf16.mxu1 %v248_v7  ;;  %215 = vmatprep.subr.bf16.mxu0 %v248_v7 }
  0x11   :  { %237 = vmatpush3.bf16.msra.mxu1 %v216_v17  ;;  %217 = vmatpush3.bf16.msra.mxu0 %v216_v17 }
  0x12   :  { %231 = vmatprep.subr.bf16.mxu1 %v248_v7  ;;  %218 = vmatprep.subr.bf16.mxu0 %v248_v7 }
  0x15   :  { %238 = vmatpush3.bf16.msra.mxu1 %v219_v20  ;;  %220 = vmatpush3.bf16.msra.mxu0 %v219_v20 }
  0x16   :  { %232 = vmatprep.subr.bf16.mxu1 %v248_v7  ;;  %221 = vmatprep.subr.bf16.mxu0 %v248_v7 }
  0x19   :  { %239 = vmatpush3.bf16.msra.mxu1 %v222_v23  ;;  %223 = vmatpush3.bf16.msra.mxu0 %v222_v23 }
  0x1a   :  { %233 = vmatprep.subr.bf16.mxu1 %v248_v7  ;;  %224 = vmatprep.subr.bf16.mxu0 %v248_v7 }
  0x1d   :  { %240 = vmatpush3.bf16.msra.mxu1 %v225_v26  ;;  %226 = vmatpush3.bf16.msra.mxu0 %v225_v26 }
  0x81   :  { %v21_v29 = vpop.permute.xlu0 %20  ;;  %v24_v30 = vpop.permute.xlu1 %23 }
  0x82   :  { %vm26_vm2 = vcmp.eq.s32.totalorder %v12_v28, %v21_v29  ;;  %vm27_vm3 = vcmp.eq.s32.totalorder %v12_v28, %v24_v30 }
  0x83   :  { %v147_v31 = vsel %vm26_vm2, 1.0, %v250_v10  ;;  %v148_v32 = vsel %vm27_vm3, 1.0, %v250_v10 }
  0x84   :  { %201 = vmatmul.mubr.msk.f32.vlgmr.msra.gmra.mrb[0].mxu1 %vm48_vm1, %v147_v31 }
  0x85   :  { %v18_v33 = vpop.permute.xlu0 %17  ;;  %203 = vmatprep.mubr.msk.f32.mxu1 %vm249_vm0, %v250_v10 }
  0x86   :  { %vm25_vm4 = vcmp.eq.s32.totalorder %v12_v28, %v18_v33 }
  0x87   :  { %v146_v34 = vsel %vm25_vm4, 1.0, %v250_v10 }
  0x88   :  { %198 = vmatmul.mubr.msk.f32.vlgmr.msra.gmra.mrb[0].mxu0 %vm48_vm1, %v146_v34  ;;  %204 = vmatmul.mubr.msk.f32.gmra.mrb[2].mxu1 %vm48_vm1, %v148_v32 }
 0x157   :  { %v129_v35 = vpop.f32.mrb[0].mxu1 }
 0x158   :  { %140 = vst.msk [vmem:[%s331_s2 + $0x8] sm:$0xff] %vm138_vm5, %v129_v35  ;;  %v202_v36 = vpop.f32.mrb[1].mxu1 }
 0x15b   :  { %v124_v37 = vpop.f32.mrb[0].mxu0  ;;  %v134_v38 = vpop.f32.mrb[2].mxu1 }
 0x15c   :  { %139 = vst.msk [vmem:[%s331_s2] sm:$0xff] %vm138_vm5, %v124_v37  ;;  %141 = vst.msk [vmem:[%s331_s2 + $0x10] sm:$0xff] %vm138_vm5, %v134_v38  ;;  %v199_v39 = vpop.f32.mrb[1].mxu0  ;;  %v205_v40 = vpop.f32.mrb[3].mxu1 }

</bundles_post_ra>
